<compile_context>
chip_gen: v7x
topology: tpu7x:2x2x1
jax: 0.10.0
libtpu: 0.0.40
codegen_flags: <defaults>
</compile_context>

<pallas_src>
import functools

import jax
import jax.numpy as jnp
from jax.experimental import pallas as pl
from jax.experimental.pallas import tpu as pltpu


def _layernorm_kernel(x_ref, g_ref, b_ref, o_ref, *, eps, m, m_pad):
    # x_ref: (TN, SUB, LANE) -- TN whole samples, each flattened (and possibly
    # zero-padded) to SUB*LANE = m_pad elements, of which the first m are real.
    # g_ref/b_ref: (SUB, 1) per-row columns or (SUB, LANE) slabs, resident
    # across all grid steps via a constant index_map.
    xf = x_ref[...].astype(jnp.float32)                          # (TN, SUB, LANE)

    # Pass 1: per-sample statistics in f32 (two-pass: mean, then centered
    # sum of squares -- avoids the cancellation of a sum/sum-sq rewrite).
    # Padded elements are zero, so the raw sum already equals the true sum.
    mean = jnp.sum(xf, axis=(1, 2), keepdims=True) * (1.0 / m)   # (TN, 1, 1)
    diff = xf - mean
    if m_pad != m:
        sub, lane = xf.shape[1], xf.shape[2]
        row = jax.lax.broadcasted_iota(jnp.int32, (sub, lane), 0)
        col = jax.lax.broadcasted_iota(jnp.int32, (sub, lane), 1)
        valid = (row * lane + col) < m
        diff = jnp.where(valid[None], diff, 0.0)                 # keep pad out of var
    # torch semantics: unbiased std (ddof=1), eps added to the std OUTSIDE the
    # sqrt.  max(m-1, 1) only guards the degenerate single-element sample.
    var = jnp.sum(diff * diff, axis=(1, 2), keepdims=True) * (1.0 / max(m - 1, 1))
    denom = jnp.sqrt(var) + eps                                  # (TN, 1, 1)
    # EUP approximate reciprocal + one Newton step: off the VALU critical path,
    # ~full f32 accuracy, and only O(TN) work.
    inv = pl.reciprocal(denom, approx=True)
    inv = inv * (2.0 - denom * inv)

    # Pass 2: normalize + per-channel affine fused into one elementwise pass.
    g = g_ref[...].astype(jnp.float32)[None]                     # (1, SUB, 1|LANE)
    b = b_ref[...].astype(jnp.float32)[None]
    o_ref[...] = (diff * inv * g + b).astype(o_ref.dtype)


def _pick_layout(M):
    """Return (SUB, LANE, M_pad): a lane-dense (LANE % 128 == 0) 2D layout for
    the flattened per-sample vector, padding M up to a 128 multiple if needed."""
    for lane in (512, 256, 128):
        if M % (8 * lane) == 0:                 # fully dense (8,128) vregs
            return M // lane, lane, M
    for lane in (512, 256, 128):
        if M % lane == 0:                       # lane-dense, partial sublanes
            return M // lane, lane, M
    lane = 128                                  # pad up to one-vreg granularity
    m_pad = ((M + 8 * lane - 1) // (8 * lane)) * (8 * lane)
    return m_pad // lane, lane, m_pad


def _vmem_capacity_bytes():
    try:
        info = pltpu.get_tpu_info()
        cap = getattr(info, "vmem_capacity_bytes", None)
        if cap:
            return int(cap)
    except Exception:
        pass
    return 64 << 20  # conservative (v7x per-TC) default


def layer_norm_pallas(x, gamma, beta, eps=1e-5):
    """x: (N, C, H, W).  gamma, beta: (C,).  Matches the PyTorch module:
    per-sample mean / unbiased std over all non-batch dims, eps added to the
    std, then per-channel affine.  (The module's N==1 branch is numerically
    identical to the per-sample path.)"""
    N, C, H, W = x.shape
    HW = H * W
    M = C * HW

    SUB, LANE, M_pad = _pick_layout(M)

    # --- per-channel affine, pre-laid-out once in the wrapper -------------
    if M_pad == M and HW % LANE == 0:
        # Each channel occupies whole (SUB, LANE) rows -> pass a per-row
        # column and let the VPU broadcast along lanes (no M-sized slab).
        rows_per_channel = HW // LANE
        g_slab = jnp.repeat(gamma.astype(jnp.float32), rows_per_channel).reshape(SUB, 1)
        b_slab = jnp.repeat(beta.astype(jnp.float32), rows_per_channel).reshape(SUB, 1)
    else:
        g_flat = jnp.repeat(gamma.astype(jnp.float32), HW)
        b_flat = jnp.repeat(beta.astype(jnp.float32), HW)
        if M_pad != M:
            g_flat = jnp.pad(g_flat, (0, M_pad - M))
            b_flat = jnp.pad(b_flat, (0, M_pad - M))
        g_slab = g_flat.reshape(SUB, LANE)
        b_slab = b_flat.reshape(SUB, LANE)

    # --- generation-aware block / VMEM budgets -----------------------------
    vmem_cap = _vmem_capacity_bytes()
    if vmem_cap >= (96 << 20):          # 128 MiB parts: v5e / v6e
        max_block_bytes = 8 << 20
        vmem_ceiling = 96 << 20
    else:                               # v7x-class: 64 MiB per TensorCore
        max_block_bytes = 4 << 20
        vmem_ceiling = 48 << 20

    bytes_per_sample = M_pad * x.dtype.itemsize
    TN = max(1, min(N, max_block_bytes // max(bytes_per_sample, 1)))
    if N > 1:
        # Keep the grid at >= 2 steps (target ~4): lets ("parallel",) shard
        # across v7x's two TensorCores and gives the pipeline an i+1 block.
        target_steps = min(N, 4)
        TN = min(TN, max(1, N // target_steps))
    # TODO(synk): if a single sample ever exceeds the block budget (huge
    # C*H*W), switch to a tiled-reduction path (grid=(N, M//T) with sum /
    # sum-of-squares scratch accumulators and a second normalize pass).

    num_steps = pl.cdiv(N, TN)
    N_pad = num_steps * TN

    # --- pad + reshape to the lane-dense layout -----------------------------
    x_flat = x.reshape(N, M)
    if M_pad != M or N_pad != N:
        x_flat = jnp.pad(x_flat, ((0, N_pad - N), (0, M_pad - M)))
    x3 = x_flat.reshape(N_pad, SUB, LANE)

    block_bytes = TN * M_pad * x.dtype.itemsize
    param_bytes = (g_slab.size + b_slab.size) * 4
    f32_temp = TN * M_pad * 4
    vmem_limit = int(
        min(
            vmem_ceiling,
            max(
                16 << 20,
                4 * block_bytes          # double-buffered input
                + 4 * block_bytes        # double-buffered output
                + param_bytes            # resident gamma/beta
                + 2 * f32_temp           # f32 temporaries / spills
                + (4 << 20),             # headroom
            ),
        )
    )

    kernel = functools.partial(_layernorm_kernel, eps=eps, m=M, m_pad=M_pad)

    cost = pl.CostEstimate(
        flops=8 * N * M,
        transcendentals=2 * N,
        bytes_accessed=2 * N * M * x.dtype.itemsize + param_bytes,
    )

    out = pl.pallas_call(
        kernel,
        out_shape=jax.ShapeDtypeStruct((N_pad, SUB, LANE), x.dtype),
        grid_spec=pltpu.PrefetchScalarGridSpec(
            num_scalar_prefetch=0,
            grid=(num_steps,),
            in_specs=[
                pl.BlockSpec((TN, SUB, LANE), lambda i: (i, 0, 0)),
                pl.BlockSpec(g_slab.shape, lambda i: (0, 0)),
                pl.BlockSpec(b_slab.shape, lambda i: (0, 0)),
            ],
            out_specs=pl.BlockSpec((TN, SUB, LANE), lambda i: (i, 0, 0)),
        ),
        compiler_params=pltpu.CompilerParams(
            dimension_semantics=("parallel",),
            vmem_limit_bytes=vmem_limit,
        ),
        cost_estimate=cost,
    )(x3, g_slab, b_slab)

    # Drop batch / lane padding and restore the original shape.
    return out.reshape(N_pad, M_pad)[:N, :M].reshape(N, C, H, W)


def reference_layer_norm(x, gamma, beta, eps=1e-5):
    # Pure-JAX reference mirroring the PyTorch module semantics.
    N = x.shape[0]
    xf = x.reshape(N, -1).astype(jnp.float32)
    mean = xf.mean(axis=1)
    std = jnp.sqrt(((xf - mean[:, None]) ** 2).sum(axis=1) / (xf.shape[1] - 1))
    shape = (N,) + (1,) * (x.ndim - 1)
    y = (x - mean.reshape(shape)) / (std.reshape(shape) + eps)
    aff = (1, -1) + (1,) * (x.ndim - 2)
    return y * gamma.reshape(aff) + beta.reshape(aff)


if __name__ == "__main__":
    key = jax.random.PRNGKey(0)
    kx, kg = jax.random.split(key)

    N, C, H, W = 2, 4, 16, 16
    x = jax.random.normal(kx, (N, C, H, W), dtype=jnp.float32)

    # Deterministic parameter init mirroring the module's __init__:
    # gamma ~ U[0, 1), beta = 0.
    gamma = jax.random.uniform(kg, (C,), dtype=jnp.float32)
    beta = jnp.zeros((C,), dtype=jnp.float32)

    out = layer_norm_pallas(x, gamma, beta, eps=1e-5)
    out = jax.block_until_ready(out)

    ref = reference_layer_norm(x, gamma, beta, eps=1e-5)
    assert out.shape == (N, C, H, W)
    assert jnp.allclose(out, ref, atol=1e-4, rtol=1e-4), "mismatch vs reference"

    print("KERNEL_OK")
</pallas_src>

<mosaic_0001>
module attributes {stable_mosaic.version = 11 : i64} {
  func.func @_layernorm_kernel(%arg0: i32, %arg1: memref<1x8x128xf32, #tpu.memory_space<vmem>>, %arg2: memref<8x1xf32, #tpu.memory_space<vmem>>, %arg3: memref<8x1xf32, #tpu.memory_space<vmem>>, %arg4: memref<1x8x128xf32, #tpu.memory_space<vmem>>) attributes {dimension_semantics = [#tpu.dimension_semantics<parallel>], iteration_bounds = array<i64: 2>, scalar_prefetch = 0 : i64, scratch_operands = 0 : i64, tpu.core_type = #tpu.core_type<tc>, window_params = [{transform_indices = @transform_0, window_bounds = array<i64: 1, 8, 128>}, {pipeline_mode = #tpu.pipeline_mode<synchronous>, transform_indices = @transform_1, window_bounds = array<i64: 8, 1>}, {pipeline_mode = #tpu.pipeline_mode<synchronous>, transform_indices = @transform_2, window_bounds = array<i64: 8, 1>}, {transform_indices = @transform_3, window_bounds = array<i64: 1, 8, 128>}]} {
    %c0 = arith.constant 0 : index
    %c0_0 = arith.constant 0 : index
    %c0_1 = arith.constant 0 : index
    %0 = vector.load %arg1[%c0, %c0_0, %c0_1] : memref<1x8x128xf32, #tpu.memory_space<vmem>>, vector<1x8x128xf32>
    %cst = arith.constant dense<0.000000e+00> : vector<1xf32>
    %1 = vector.multi_reduction <add>, %0, %cst [1, 2] : vector<1x8x128xf32> to vector<1xf32>
    %2 = vector.shape_cast %1 : vector<1xf32> to vector<1x1x1xf32>
    %cst_2 = arith.constant 9.765625E-4 : f32
    %3 = vector.broadcast %cst_2 : f32 to vector<1x1x1xf32>
    %4 = arith.mulf %2, %3 : vector<1x1x1xf32>
    %5 = vector.broadcast %4 : vector<1x1x1xf32> to vector<1x8x128xf32>
    %6 = arith.subf %0, %5 : vector<1x8x128xf32>
    %7 = arith.mulf %6, %6 : vector<1x8x128xf32>
    %cst_3 = arith.constant dense<0.000000e+00> : vector<1xf32>
    %8 = vector.multi_reduction <add>, %7, %cst_3 [1, 2] : vector<1x8x128xf32> to vector<1xf32>
    %9 = vector.shape_cast %8 : vector<1xf32> to vector<1x1x1xf32>
    %cst_4 = arith.constant 9.77517105E-4 : f32
    %10 = vector.broadcast %cst_4 : f32 to vector<1x1x1xf32>
    %11 = arith.mulf %9, %10 : vector<1x1x1xf32>
    %12 = math.sqrt %11 : vector<1x1x1xf32>
    %cst_5 = arith.constant 9.99999974E-6 : f32
    %13 = vector.broadcast %cst_5 : f32 to vector<1x1x1xf32>
    %14 = arith.addf %12, %13 : vector<1x1x1xf32>
    %15 = tpu.reciprocal %14 {approx = true} : vector<1x1x1xf32> -> vector<1x1x1xf32>
    %16 = arith.mulf %14, %15 : vector<1x1x1xf32>
    %cst_6 = arith.constant 2.000000e+00 : f32
    %17 = vector.broadcast %cst_6 : f32 to vector<1x1x1xf32>
    %18 = arith.subf %17, %16 : vector<1x1x1xf32>
    %19 = arith.mulf %15, %18 : vector<1x1x1xf32>
    %c0_7 = arith.constant 0 : index
    %c0_8 = arith.constant 0 : index
    %20 = vector.load %arg2[%c0_7, %c0_8] : memref<8x1xf32, #tpu.memory_space<vmem>>, vector<8x1xf32>
    %21 = vector.shape_cast %20 : vector<8x1xf32> to vector<1x8x1xf32>
    %c0_9 = arith.constant 0 : index
    %c0_10 = arith.constant 0 : index
    %22 = vector.load %arg3[%c0_9, %c0_10] : memref<8x1xf32, #tpu.memory_space<vmem>>, vector<8x1xf32>
    %23 = vector.shape_cast %22 : vector<8x1xf32> to vector<1x8x1xf32>
    %24 = vector.broadcast %19 : vector<1x1x1xf32> to vector<1x8x128xf32>
    %25 = arith.mulf %6, %24 : vector<1x8x128xf32>
    %26 = vector.broadcast %21 : vector<1x8x1xf32> to vector<1x8x128xf32>
    %27 = arith.mulf %25, %26 : vector<1x8x128xf32>
    %28 = vector.broadcast %23 : vector<1x8x1xf32> to vector<1x8x128xf32>
    %29 = arith.addf %27, %28 : vector<1x8x128xf32>
    %c0_11 = arith.constant 0 : index
    %c0_12 = arith.constant 0 : index
    %c0_13 = arith.constant 0 : index
    %30 = vector.load %arg4[%c0_11, %c0_12, %c0_13] : memref<1x8x128xf32, #tpu.memory_space<vmem>>, vector<1x8x128xf32>
    tpu.vector_store %arg4[%c0_11, %c0_12, %c0_13], %29 {strides = array<i32>} : memref<1x8x128xf32, #tpu.memory_space<vmem>>, vector<1x8x128xf32>,
    return
  }
  func.func @transform_0(%arg0: i32) -> (i32, i32, i32) {
    %c0_i32 = arith.constant 0 : i32
    %c0_i32_0 = arith.constant 0 : i32
    %c0_i32_1 = arith.constant 0 : i32
    return %arg0, %c0_i32, %c0_i32_0 : i32, i32, i32
  }
  func.func @transform_1(%arg0: i32) -> (i32, i32) {
    %c0_i32 = arith.constant 0 : i32
    %c0_i32_0 = arith.constant 0 : i32
    %c0_i32_1 = arith.constant 0 : i32
    return %c0_i32, %c0_i32_0 : i32, i32
  }
  func.func @transform_2(%arg0: i32) -> (i32, i32) {
    %c0_i32 = arith.constant 0 : i32
    %c0_i32_0 = arith.constant 0 : i32
    %c0_i32_1 = arith.constant 0 : i32
    return %c0_i32, %c0_i32_0 : i32, i32
  }
  func.func @transform_3(%arg0: i32) -> (i32, i32, i32) {
    %c0_i32 = arith.constant 0 : i32
    %c0_i32_0 = arith.constant 0 : i32
    %c0_i32_1 = arith.constant 0 : i32
    return %arg0, %c0_i32, %c0_i32_0 : i32, i32, i32
  }
}

</mosaic_0001>

<bundles_post_ra>
// kernel: tpu_custom_call.1
= control target key start
LH: loop header
LB: loop body
LE: loop exit
PB: predicated region body
PF: predicated region fallthrough
CT: control target
= control target key end

     0   :  { %8 = vsyncpa [#allocation3], 0  ;;  %s536_s0 = inlined_call_operand.vmem [shape: f32[2,8,128], index: 0, kind: input, shape index: {}]   ;;  %s537_s1 = inlined_call_operand.vmem [shape: f32[8,1], index: 1, kind: input, shape index: {}]   ;;  %s538_s2 = inlined_call_operand.vmem [shape: f32[8,1], index: 2, kind: input, shape index: {}]   ;;  %s539_s3 = inlined_call_operand.hbm [shape: f32[2,8,128], index: 3, kind: output, shape index: {}]  }
   0x1   :  { %10 = vsyncpa [#allocation3 + $0x1], 0  ;;  %s430_s12 = smov 0   ;;  %s432_s13 = smov 0  }
   0x2   :  { %s434_s14 = smov 0   ;;  %s436_s15 = smov 0  }
   0x3 LB: > { %s451_s16 = sadd.s32 4294967295, %s406_s15   ;;  %s288_s17 = sadd.s32 4294967294, %s406_s15   ;;  %s406_s15 = sphi %s436_s15, %s545_s15   ;;  %s402_s14 = sphi %s434_s14, %s544_s14   ;;  %s398_s13 = sphi %s432_s13, %s543_s13   ;;  %s394_s12 = sphi %s430_s12, %s542_s12  }
   0x4   : > { %s455_s18 = sadd.s32 1, %s406_s15   ;;  %s91_s19 = sadd.s32 1, %s402_s14 }
   0x5   : > { %s88_s20 = ssub.s32 %s406_s15, %s455_s18  ;;  %p101_p0 = scmp.ne.s32.totalorder %s402_s14, %s398_s13 }
   0x6   : > { %p89_p1 = scmp.eq.s32.totalorder %s88_s20, 0  ;;  %p102_p2 = scmp.eq.s32.totalorder %s451_s16, 1 }
   0x7   : > { %p107_p3 = scmp.ne.s32.totalorder %s398_s13, %s394_s12  ;;  %p108_p4 = scmp.eq.s32.totalorder %s288_s17, 1 }
   0x8   : > { %s466_s21 = scalar_select %p89_p1, %s402_s14, %s91_s19  }
   0x9   : > { %p468_p5 = por %p102_p2, %p101_p0  ;;  %p472_p6 = por %p108_p4, %p107_p3 }
   0xa   : > { %p291_p7 = scmp.ge.s32.totalorder %s406_s15, 1  ;;  %p139_p8 = scmp.lt.s32.totalorder %s406_s15, 3 }
   0xc   : > { %p140_p9 = pnand %p291_p7, %p139_p8 }
   0xd   : > { %p162_p10 = scmp.lt.s32.totalorder (!%p140_p9), %s451_s16, 1  ;;  %v199_v1 = vld [vmem:[%s537_s1] sm:$0xff] (!%p140_p9)  ;;  %v408_v2 = vmov (!%p140_p9), 0   ;;  %s159_s6 = sand.u32 (!%p140_p9), 1, %s398_s13  }
   0xe   : > { %143 = sbr.rel (%p140_p9) target bundleno = 396 (0x18c), region = 32  ;;  %338 = vset.pattern.permute.xlu1 (!%p140_p9), %v408_v2  ;;  %339 = vset.pattern.permute.xlu0 (!%p140_p9), %v408_v2  ;;  %v200_v3 = vld [vmem:[%s538_s2] sm:$0xff] (!%p140_p9)  ;;  %s292_s7 = sshll.u32 (!%p140_p9), %s159_s6, 3 }
   0xf   : > { %204 = vperm.xlu1 (!%p140_p9), %338, %v199_v1   ;;  %s295_s8 = sshll.u32 (!%p140_p9), %s451_s16, 7  ;;  %s161_s9 = scalar_lea.vmem (!%p140_p9), [#allocation2], %s292_s7 }
  0x10   : > { %s229_s10 = sshll.u32 (!%p140_p9), %s161_s9, 4  ;;  %s494_s19 = scalar_lea.hbm (!%p140_p9), %s539_s3, %s295_s8  ;;  %s496_s10 = int_to_ptr.vmem [resolvable:$true] %s229_s10 }
  0x11   : > { %s216_s20 = scalar_lea.sflag (!%p140_p9), [#allocation3], %s159_s6 }
  0x13   : > { %210 = vperm.xlu1 (!%p140_p9), %338, %v200_v3  }
  0x15   : > { %s163_s24 = scalar_select %p162_p10, %s451_s16, 1 }
  0x16   : > { %s409_s16 = smov [#allocation2]  }
  0x17   : > { %s293_s25 = sshll.u32 %s163_s24, 3  ;;  %s344_s24 = scalar_lea.vmem %s496_s10, 128 }
  0x18   : > { %s165_s28 = scalar_lea.vmem %s536_s0, %s293_s25  ;;  %p345_p11 = scmp.ne.s32.totalorder %s496_s10, %s344_s24 }
  0x19   : > { %v166_v0 = vld [vmem:[%s165_s28] sm:$0xff]  ;;  %s348_s25 = sshll.u32 %s409_s16, 4  ;;  %s349_s25 = int_to_ptr.vmem [resolvable:$false] %s348_s25 }
  0x1a   : > { %167 = vadd.xlane.f32.xlu0 %v166_v0  ;;  %p346_p12 = pnand %p345_p11, %p468_p5  ;;  %s350_s26 = scalar_lea.vmem %s349_s25, 256 }
  0x1b   : > { %p351_p0 = scmp.lt.s32.totalorder %s496_s10, %s349_s25  ;;  %p352_p1 = scmp.lt.s32.totalorder %s350_s26, %s344_s24 }
  0x1c   : > { %p347_p13 = pneg %p346_p12 }
  0x1d   : > { %p353_p2 = por %p352_p1, %p351_p0 }
  0x1f   : > { %p354_p3 = pnand %p353_p2, %p347_p13 }
  0x8e   : > { %v205_v31 = vpop.permute.xlu1 %204 }
  0x92   : > { %v211_v35 = vpop.permute.xlu1 %210 }
  0xa7   : > { %v168_v4 = vpop.xlane.xlu0 %167 }
  0xa8   : > { %v169_v5 = vrot.slane %v168_v4, 4 }
  0xaa   : > { %v170_v6 = vadd.f32 %v169_v5, %v168_v4 }
  0xac   : > { %v171_v7 = vrot.slane %v170_v6, 2 }
  0xae   : > { %v172_v8 = vadd.f32 %v171_v7, %v170_v6 }
  0xb0   : > { %v173_v9 = vrot.slane %v172_v8, 1 }
  0xb2   : > { %v174_v10 = vadd.f32 %v173_v9, %v172_v8 }
  0xb4   : > { %v175_v11 = vmul.f32 0.0009765625, %v174_v10 }
  0xb6   : > { %v176_v12 = vsub.f32 %v166_v0, %v175_v11 }
  0xb8   : > { %v177_v13 = vmul.f32 %v176_v12, %v176_v12 }
  0xba   : > { %178 = vadd.xlane.f32.xlu0 %v177_v13 }
 0x147   : > { %v179_v14 = vpop.xlane.xlu0 %178 }
 0x148   : > { %v180_v15 = vrot.slane %v179_v14, 4 }
 0x14a   : > { %v181_v16 = vadd.f32 %v180_v15, %v179_v14 }
 0x14c   : > { %v182_v17 = vrot.slane %v181_v16, 2 }
 0x14e   : > { %v183_v18 = vadd.f32 %v182_v17, %v181_v16 }
 0x150   : > { %v184_v19 = vrot.slane %v183_v18, 1 }
 0x152   : > { %v185_v20 = vadd.f32 %v184_v19, %v183_v18 }
 0x154   : > { %v186_v21 = vmul.f32 0.0009775171, %v185_v20 }
 0x156   : > { %340 = vrsqrt.f32 %v186_v21  ;;  %vm189_vm0 = vcmp.eq.f32.partialorder %v186_v21, inf  ;;  %v192_v24 = vand.u32 2147483648, %v186_v21  ;;  %vm191_vm1 = vcmp.eq.f32.partialorder %v186_v21, 0.0 }
 0x160   : > { %v341_v22 = vpop.eup %340 }
 0x161   : > { %v188_v23 = vmul.f32 %v341_v22, %v186_v21 }
 0x163   : > { %v190_v25 = vsel %vm189_vm0, %v186_v21, %v188_v23 }
 0x164   : > { %v193_v26 = vsel %vm191_vm1, %v192_v24, %v190_v25 }
 0x165   : > { %v194_v27 = vadd.f32 1e-05, %v193_v26 }
 0x167   : > { %342 = vrcp.f32 %v194_v27 }
 0x171   : > { %v343_v28 = vpop.eup %342 }
 0x172   : > { %v196_v29 = vmul.f32 %v343_v28, %v194_v27 }
 0x174   : > { %v197_v30 = vsub.f32 2.0, %v196_v29 }
 0x176   : > { %v198_v32 = vmul.f32 %v343_v28, %v197_v30 }
 0x178   : > { %v201_v33 = vmul.f32 %v198_v32, %v176_v12 }
 0x17a   : > { %v207_v34 = vmul.f32 %v205_v31, %v201_v33 }
 0x17c   : > { %v213_v36 = vadd.f32 %v211_v35, %v207_v34 }
 0x17e   : > { %214 = vst [vmem:[%s161_s9] sm:$0xff] %v213_v36 }
 0x17f   : > { %357 = shalt.err (!%p354_p3)
}
 0x180   : > { %s358_s27 = scalar_lea.hbm %s494_s19, 128  ;;  %s362_s30 = scalar_lea.hbm %s539_s3, 256 }
 0x181   : > { %p359_p4 = scmp.ne.s32.totalorder %s494_s19, %s358_s27  ;;  %p363_p9 = scmp.lt.u32.totalorder %s494_s19, %s539_s3 }
 0x182   : > { %p364_p10 = scmp.lt.u32.totalorder %s362_s30, %s358_s27  ;;  %p366_p12 = scmp.lt.u32.totalorder %s358_s27, %s494_s19 }
 0x183   : > { %p360_p7 = pnand %p359_p4, %p468_p5 }
 0x184   : > { %p365_p11 = por %p364_p10, %p363_p9 }
 0x185   : > { %p361_p8 = pneg %p360_p7 }
 0x186   : > { %p367_p13 = por %p366_p12, %p365_p11 }
 0x188   : > { %p368_p0 = pnand %p367_p13, %p361_p8 }
 0x18a   : > { %371 = shalt.err (!%p368_p0)
}
 0x18b   : > { %298 = dma.vmem_to_hbm [thread:$0]  (%p468_p5), %s496_s10, 128, %s494_s19, %s216_s20  }
 0x18c PF: > { %p304_p1 = scmp.ge.s32.totalorder %s406_s15, 2  ;;  %s241_s6 = sand.u32 1, %s394_s12  }
 0x18d   : > { %s242_s7 = scalar_lea.sflag [#allocation3], %s241_s6 }
 0x18e   : > { %p301_p2 = pnand %p304_p1, %p472_p6 }
 0x190   : > { %389 = dma.done.wait (!%p301_p2), %s242_s7, 128  }
 0x191   : > { %391 = vsyncadd (!%p301_p2), %s242_s7, 4294967168  ;;  %p13_p3 = scmp.ge.s32.totalorder %s455_s18, 4   ;;  %s542_s12 = smov %s398_s13 }
 0x192   : > { %s543_s13 = smov %s402_s14  ;;  %s544_s14 = smov %s466_s21 }
 0x193   : > { %s545_s15 = smov %s455_s18  ;;  %15 = sbr.rel (!%p13_p3) target bundleno = 3 (0x3), region = 67 }
 0x19a   :  { %247 = vsyncpa [#allocation3], 1 }
 0x19b   :  { %249 = vsyncpa [#allocation3 + $0x1], 1 }

</bundles_post_ra>
